<compile_context>
chip_gen: v7x
topology: tpu7x:2x2x1
jax: 0.10.0
libtpu: 0.0.40
codegen_flags: <defaults>
</compile_context>

<pallas_src>
import functools

import jax
import jax.numpy as jnp
from jax.experimental import pallas as pl
from jax.experimental.pallas import tpu as pltpu


def _round_up(n, m):
    return ((n + m - 1) // m) * m


def _vmem_tile_bytes(shape, itemsize, sublane):
    """Approx VMEM footprint of a 2-D tile after (sublane, 128) layout padding."""
    r, c = shape
    return _round_up(max(r, 1), sublane) * _round_up(max(c, 1), 128) * itemsize


def _mlp_fused_kernel(*refs, n_layers):
    # refs = (x_ref, w0, b0, w1, b1, ..., o_ref)
    x_ref = refs[0]
    o_ref = refs[-1]
    wb = refs[1:-1]

    # Cast once in-kernel: avoids a separate XLA pad/cast pass over x in HBM.
    h = x_ref[...].astype(jnp.bfloat16)                         # (tm, din)
    for l in range(n_layers):
        w = wb[2 * l][...]                                      # bf16 (k, n)
        b = wb[2 * l + 1][...]                                  # f32  (1, n)
        y = jnp.dot(h, w, preferred_element_type=jnp.float32)   # MXU, f32 acc
        y = jnp.maximum(y + b, 0.0)                             # bias + ReLU (f32, VPU)
        # Re-quantize to bf16 only to feed the next MXU pass; keep f32 at end.
        h = y.astype(jnp.bfloat16) if l < n_layers - 1 else y
    o_ref[...] = h.astype(o_ref.dtype)


def init_mlp_params(key, dims):
    """PyTorch-style nn.Linear params: list of (w (dout, din), b (dout,)), fp32."""
    params = []
    for din, dout in zip(dims[:-1], dims[1:]):
        key, kw, kb = jax.random.split(key, 3)
        bound = 1.0 / jnp.sqrt(din)
        w = jax.random.uniform(kw, (dout, din), jnp.float32, -bound, bound)
        b = jax.random.uniform(kb, (dout,), jnp.float32, -bound, bound)
        params.append((w, b))
    return params


def prepare_mlp_params(params):
    """One-time prep: transpose weights to (din, dout), cast to bf16; bias f32.

    No zero-padding: weight/bias blocks are passed at full extent, which
    satisfies the (8,128) BlockSpec rule without materializing pad in HBM.
    Returns (layers, in_dim, out_dim) with layers = [(w (din,dout) bf16,
    b (1,dout) f32), ...].
    """
    layers = []
    in_dim = params[0][0].shape[1]
    out_dim = params[-1][0].shape[0]
    for w, b in params:
        layers.append((jnp.asarray(w.T, jnp.bfloat16),
                       jnp.asarray(b, jnp.float32).reshape(1, -1)))
    return layers, in_dim, out_dim


def _build_mlp_call(kernel, M, tm_eff, din, layer_dims, out_dim, out_dtype,
                    weight_buffer_count):
    grid = (pl.cdiv(M, tm_eff),)
    out_itemsize = jnp.dtype(out_dtype).itemsize

    # Grid-invariant weight/bias blocks: constant index_map => fetched once.
    w_kwargs = {}
    if weight_buffer_count is not None:
        w_kwargs["pipeline_mode"] = pl.Buffered(weight_buffer_count)

    in_specs = [pl.BlockSpec((tm_eff, din), lambda i: (i, 0))]
    for (k, n) in layer_dims:
        in_specs.append(pl.BlockSpec((k, n), lambda i: (0, 0), **w_kwargs))
        in_specs.append(pl.BlockSpec((1, n), lambda i: (0, 0), **w_kwargs))
    out_specs = pl.BlockSpec((tm_eff, out_dim), lambda i: (i, 0))

    # VMEM budget: resident weights/biases (x buffer count), double-buffered
    # I/O tiles, activation temporaries + margin.  Clamp to 64 MiB so the same
    # constants are also legal on v7x (64 MiB physical VMEM per TensorCore).
    wbufs = weight_buffer_count if weight_buffer_count else 2
    est = 2 * _vmem_tile_bytes((tm_eff, din), 4, 8)              # x tiles (f32)
    est += 2 * _vmem_tile_bytes((tm_eff, out_dim), out_itemsize, 8)
    for (k, n) in layer_dims:
        est += wbufs * _vmem_tile_bytes((k, n), 2, 16)           # bf16 weights
        est += wbufs * _vmem_tile_bytes((1, n), 4, 8)            # f32 biases
    max_n = max(n for _, n in layer_dims)
    est += 3 * _vmem_tile_bytes((tm_eff, max_n), 4, 8)           # f32/bf16 temps
    vmem_limit = int(min(max(2 * est + (8 << 20), 32 << 20), 64 << 20))

    # Advisory scheduling hint for XLA (free).
    flops = 2 * M * sum(k * n for k, n in layer_dims)
    bytes_accessed = (M * din * 4
                      + sum(k * n * 2 + n * 4 for k, n in layer_dims)
                      + M * out_dim * out_itemsize)

    return pl.pallas_call(
        kernel,
        out_shape=jax.ShapeDtypeStruct((M, out_dim), out_dtype),
        grid_spec=pltpu.PrefetchScalarGridSpec(
            num_scalar_prefetch=0,
            grid=grid,
            in_specs=in_specs,
            out_specs=out_specs,
        ),
        compiler_params=pltpu.CompilerParams(
            dimension_semantics=("parallel",),
            vmem_limit_bytes=vmem_limit,
        ),
        cost_estimate=pl.CostEstimate(
            flops=flops, transcendentals=0, bytes_accessed=bytes_accessed),
    )


def mlp_forward(x, prepped, *, tm=512, out_dtype=jnp.float32, min_batch_tiles=1):
    """Fused forward of (Linear -> ReLU) x L.  x: (M, in_dim) float32.

    out_dtype=jnp.bfloat16 halves output writeback (accuracy already bounded
    by bf16 MXU operands).  On v7x pass min_batch_tiles=2 so the "parallel"
    batch axis spans both TensorCores; on v5e/v6e (1 TC) keep the default.
    """
    layers, in_dim, out_dim = prepped
    M, din = x.shape
    assert din == in_dim, f"expected input width {in_dim}, got {din}"
    layer_dims = [tuple(w.shape) for (w, _) in layers]

    tm_eff = min(tm, M)
    if min_batch_tiles > 1 and M > 8:
        tm_eff = min(tm_eff, max(8, _round_up(pl.cdiv(M, min_batch_tiles), 8)))

    flat_args = [x]
    for (w, b) in layers:
        flat_args += [w, b]
    kernel = functools.partial(_mlp_fused_kernel, n_layers=len(layers))

    # Prefer single-buffered grid-invariant weight blocks (halves resident
    # weight VMEM); fall back to default pipelining if this JAX build rejects
    # pipeline_mode on the top-level TPU grid.
    try:
        call = _build_mlp_call(kernel, M, tm_eff, din, layer_dims, out_dim,
                               out_dtype, weight_buffer_count=1)
        return jax.block_until_ready(call(*flat_args))
    except Exception:
        call = _build_mlp_call(kernel, M, tm_eff, din, layer_dims, out_dim,
                               out_dtype, weight_buffer_count=None)
        return call(*flat_args)


def mlp_reference(x, params):
    h = x
    for (w, b) in params:
        h = jnp.maximum(h @ w.T + b, 0.0)
    return h


if __name__ == "__main__":
    key = jax.random.PRNGKey(0)
    batch = 8
    dims = [32, 64, 32]          # MLP(input_dim=32, dims=[32, 64, 32])

    kx, kp = jax.random.split(key)
    x = jax.random.normal(kx, (batch, dims[0]), jnp.float32)
    params = init_mlp_params(kp, dims)
    prepped = prepare_mlp_params(params)   # one-time transpose + bf16 cast

    out = mlp_forward(x, prepped)
    out = jax.block_until_ready(out)

    ref = mlp_reference(x, params)
    assert out.shape == (batch, dims[-1]), out.shape
    # bf16 MXU operands with f32 accumulation => looser tolerance than pure f32.
    assert jnp.allclose(out, ref, atol=3e-2, rtol=3e-2), "mismatch vs reference"

    print("KERNEL_OK")
</pallas_src>

<mosaic_0001>
module attributes {stable_mosaic.version = 11 : i64} {
  func.func @_mlp_fused_kernel(%arg0: i32, %arg1: memref<8x32xf32, #tpu.memory_space<vmem>>, %arg2: memref<32x64xbf16, #tpu.memory_space<vmem>>, %arg3: memref<1x64xf32, #tpu.memory_space<vmem>>, %arg4: memref<64x32xbf16, #tpu.memory_space<vmem>>, %arg5: memref<1x32xf32, #tpu.memory_space<vmem>>, %arg6: memref<8x32xf32, #tpu.memory_space<vmem>>) attributes {dimension_semantics = [#tpu.dimension_semantics<parallel>], iteration_bounds = array<i64: 1>, scalar_prefetch = 0 : i64, scratch_operands = 0 : i64, tpu.core_type = #tpu.core_type<tc>, window_params = [{transform_indices = @transform_0, window_bounds = array<i64: 8, 32>}, {pipeline_mode = #tpu.pipeline_mode<synchronous>, transform_indices = @transform_1, window_bounds = array<i64: 32, 64>}, {pipeline_mode = #tpu.pipeline_mode<synchronous>, transform_indices = @transform_2, window_bounds = array<i64: 1, 64>}, {pipeline_mode = #tpu.pipeline_mode<synchronous>, transform_indices = @transform_3, window_bounds = array<i64: 64, 32>}, {pipeline_mode = #tpu.pipeline_mode<synchronous>, transform_indices = @transform_4, window_bounds = array<i64: 1, 32>}, {transform_indices = @transform_5, window_bounds = array<i64: 8, 32>}]} {
    %c0 = arith.constant 0 : index
    %c0_0 = arith.constant 0 : index
    %0 = vector.load %arg1[%c0, %c0_0] : memref<8x32xf32, #tpu.memory_space<vmem>>, vector<8x32xf32>
    %1 = arith.truncf %0 : vector<8x32xf32> to vector<8x32xbf16>
    %c0_1 = arith.constant 0 : index
    %c0_2 = arith.constant 0 : index
    %2 = vector.load %arg2[%c0_1, %c0_2] : memref<32x64xbf16, #tpu.memory_space<vmem>>, vector<32x64xbf16>
    %c0_3 = arith.constant 0 : index
    %c0_4 = arith.constant 0 : index
    %3 = vector.load %arg3[%c0_3, %c0_4] : memref<1x64xf32, #tpu.memory_space<vmem>>, vector<1x64xf32>
    %cst = arith.constant dense<0.000000e+00> : vector<8x64xf32>
    %4 = tpu.matmul %1, %2, %cst {dimension_numbers = #tpu.dot_dimension_numbers<[1], [0], [0], [1], [0, 0, 1, 1], [], []>} : vector<8x32xbf16>, vector<32x64xbf16>, vector<8x64xf32> -> vector<8x64xf32>
    %5 = vector.broadcast %3 : vector<1x64xf32> to vector<8x64xf32>
    %6 = arith.addf %4, %5 : vector<8x64xf32>
    %cst_5 = arith.constant 0.000000e+00 : f32
    %7 = vector.broadcast %cst_5 : f32 to vector<8x64xf32>
    %8 = arith.maximumf %6, %7 : vector<8x64xf32>
    %9 = arith.truncf %8 : vector<8x64xf32> to vector<8x64xbf16>
    %c0_6 = arith.constant 0 : index
    %c0_7 = arith.constant 0 : index
    %10 = vector.load %arg4[%c0_6, %c0_7] : memref<64x32xbf16, #tpu.memory_space<vmem>>, vector<64x32xbf16>
    %c0_8 = arith.constant 0 : index
    %c0_9 = arith.constant 0 : index
    %11 = vector.load %arg5[%c0_8, %c0_9] : memref<1x32xf32, #tpu.memory_space<vmem>>, vector<1x32xf32>
    %cst_10 = arith.constant dense<0.000000e+00> : vector<8x32xf32>
    %12 = tpu.matmul %9, %10, %cst_10 {dimension_numbers = #tpu.dot_dimension_numbers<[1], [0], [0], [1], [0, 0, 1, 1], [], []>} : vector<8x64xbf16>, vector<64x32xbf16>, vector<8x32xf32> -> vector<8x32xf32>
    %13 = vector.broadcast %11 : vector<1x32xf32> to vector<8x32xf32>
    %14 = arith.addf %12, %13 : vector<8x32xf32>
    %cst_11 = arith.constant 0.000000e+00 : f32
    %15 = vector.broadcast %cst_11 : f32 to vector<8x32xf32>
    %16 = arith.maximumf %14, %15 : vector<8x32xf32>
    %c0_12 = arith.constant 0 : index
    %c0_13 = arith.constant 0 : index
    %17 = vector.load %arg6[%c0_12, %c0_13] : memref<8x32xf32, #tpu.memory_space<vmem>>, vector<8x32xf32>
    tpu.vector_store %arg6[%c0_12, %c0_13], %16 {strides = array<i32>} : memref<8x32xf32, #tpu.memory_space<vmem>>, vector<8x32xf32>,
    return
  }
  func.func @transform_0(%arg0: i32) -> (i32, i32) {
    %c0_i32 = arith.constant 0 : i32
    %c0_i32_0 = arith.constant 0 : i32
    return %arg0, %c0_i32 : i32, i32
  }
  func.func @transform_1(%arg0: i32) -> (i32, i32) {
    %c0_i32 = arith.constant 0 : i32
    %c0_i32_0 = arith.constant 0 : i32
    %c0_i32_1 = arith.constant 0 : i32
    return %c0_i32, %c0_i32_0 : i32, i32
  }
  func.func @transform_2(%arg0: i32) -> (i32, i32) {
    %c0_i32 = arith.constant 0 : i32
    %c0_i32_0 = arith.constant 0 : i32
    %c0_i32_1 = arith.constant 0 : i32
    return %c0_i32, %c0_i32_0 : i32, i32
  }
  func.func @transform_3(%arg0: i32) -> (i32, i32) {
    %c0_i32 = arith.constant 0 : i32
    %c0_i32_0 = arith.constant 0 : i32
    %c0_i32_1 = arith.constant 0 : i32
    return %c0_i32, %c0_i32_0 : i32, i32
  }
  func.func @transform_4(%arg0: i32) -> (i32, i32) {
    %c0_i32 = arith.constant 0 : i32
    %c0_i32_0 = arith.constant 0 : i32
    %c0_i32_1 = arith.constant 0 : i32
    return %c0_i32, %c0_i32_0 : i32, i32
  }
  func.func @transform_5(%arg0: i32) -> (i32, i32) {
    %c0_i32 = arith.constant 0 : i32
    %c0_i32_0 = arith.constant 0 : i32
    return %arg0, %c0_i32 : i32, i32
  }
}

module attributes {stable_mosaic.version = 11 : i64} {
  func.func @_mlp_fused_kernel(%arg0: i32, %arg1: memref<8x32xf32, #tpu.memory_space<vmem>>, %arg2: memref<32x64xbf16, #tpu.memory_space<vmem>>, %arg3: memref<1x64xf32, #tpu.memory_space<vmem>>, %arg4: memref<64x32xbf16, #tpu.memory_space<vmem>>, %arg5: memref<1x32xf32, #tpu.memory_space<vmem>>, %arg6: memref<8x32xf32, #tpu.memory_space<vmem>>) attributes {dimension_semantics = [#tpu.dimension_semantics<parallel>], iteration_bounds = array<i64: 1>, scalar_prefetch = 0 : i64, scratch_operands = 0 : i64, tpu.core_type = #tpu.core_type<tc>, window_params = [{transform_indices = @transform_0, window_bounds = array<i64: 8, 32>}, {pipeline_mode = #tpu.pipeline_mode<synchronous>, transform_indices = @transform_1, window_bounds = array<i64: 32, 64>}, {pipeline_mode = #tpu.pipeline_mode<synchronous>, transform_indices = @transform_2, window_bounds = array<i64: 1, 64>}, {pipeline_mode = #tpu.pipeline_mode<synchronous>, transform_indices = @transform_3, window_bounds = array<i64: 64, 32>}, {pipeline_mode = #tpu.pipeline_mode<synchronous>, transform_indices = @transform_4, window_bounds = array<i64: 1, 32>}, {transform_indices = @transform_5, window_bounds = array<i64: 8, 32>}]} {
    %c0 = arith.constant 0 : index
    %c0_0 = arith.constant 0 : index
    %0 = vector.load %arg1[%c0, %c0_0] : memref<8x32xf32, #tpu.memory_space<vmem>>, vector<8x32xf32>
    %1 = arith.truncf %0 : vector<8x32xf32> to vector<8x32xbf16>
    %c0_1 = arith.constant 0 : index
    %c0_2 = arith.constant 0 : index
    %2 = vector.load %arg2[%c0_1, %c0_2] : memref<32x64xbf16, #tpu.memory_space<vmem>>, vector<32x64xbf16>
    %c0_3 = arith.constant 0 : index
    %c0_4 = arith.constant 0 : index
    %3 = vector.load %arg3[%c0_3, %c0_4] : memref<1x64xf32, #tpu.memory_space<vmem>>, vector<1x64xf32>
    %cst = arith.constant dense<0.000000e+00> : vector<8x64xf32>
    %4 = tpu.matmul %1, %2, %cst {dimension_numbers = #tpu.dot_dimension_numbers<[1], [0], [0], [1], [0, 0, 1, 1], [], []>} : vector<8x32xbf16>, vector<32x64xbf16>, vector<8x64xf32> -> vector<8x64xf32>
    %5 = vector.broadcast %3 : vector<1x64xf32> to vector<8x64xf32>
    %6 = arith.addf %4, %5 : vector<8x64xf32>
    %cst_5 = arith.constant 0.000000e+00 : f32
    %7 = vector.broadcast %cst_5 : f32 to vector<8x64xf32>
    %8 = arith.maximumf %6, %7 : vector<8x64xf32>
    %9 = arith.truncf %8 : vector<8x64xf32> to vector<8x64xbf16>
    %c0_6 = arith.constant 0 : index
    %c0_7 = arith.constant 0 : index
    %10 = vector.load %arg4[%c0_6, %c0_7] : memref<64x32xbf16, #tpu.memory_space<vmem>>, vector<64x32xbf16>
    %c0_8 = arith.constant 0 : index
    %c0_9 = arith.constant 0 : index
    %11 = vector.load %arg5[%c0_8, %c0_9] : memref<1x32xf32, #tpu.memory_space<vmem>>, vector<1x32xf32>
    %cst_10 = arith.constant dense<0.000000e+00> : vector<8x32xf32>
    %12 = tpu.matmul %9, %10, %cst_10 {dimension_numbers = #tpu.dot_dimension_numbers<[1], [0], [0], [1], [0, 0, 1, 1], [], []>} : vector<8x64xbf16>, vector<64x32xbf16>, vector<8x32xf32> -> vector<8x32xf32>
    %13 = vector.broadcast %11 : vector<1x32xf32> to vector<8x32xf32>
    %14 = arith.addf %12, %13 : vector<8x32xf32>
    %cst_11 = arith.constant 0.000000e+00 : f32
    %15 = vector.broadcast %cst_11 : f32 to vector<8x32xf32>
    %16 = arith.maximumf %14, %15 : vector<8x32xf32>
    %c0_12 = arith.constant 0 : index
    %c0_13 = arith.constant 0 : index
    %17 = vector.load %arg6[%c0_12, %c0_13] : memref<8x32xf32, #tpu.memory_space<vmem>>, vector<8x32xf32>
    tpu.vector_store %arg6[%c0_12, %c0_13], %16 {strides = array<i32>} : memref<8x32xf32, #tpu.memory_space<vmem>>, vector<8x32xf32>,
    return
  }
  func.func @transform_0(%arg0: i32) -> (i32, i32) {
    %c0_i32 = arith.constant 0 : i32
    %c0_i32_0 = arith.constant 0 : i32
    return %arg0, %c0_i32 : i32, i32
  }
  func.func @transform_1(%arg0: i32) -> (i32, i32) {
    %c0_i32 = arith.constant 0 : i32
    %c0_i32_0 = arith.constant 0 : i32
    %c0_i32_1 = arith.constant 0 : i32
    return %c0_i32, %c0_i32_0 : i32, i32
  }
  func.func @transform_2(%arg0: i32) -> (i32, i32) {
    %c0_i32 = arith.constant 0 : i32
    %c0_i32_0 = arith.constant 0 : i32
    %c0_i32_1 = arith.constant 0 : i32
    return %c0_i32, %c0_i32_0 : i32, i32
  }
  func.func @transform_3(%arg0: i32) -> (i32, i32) {
    %c0_i32 = arith.constant 0 : i32
    %c0_i32_0 = arith.constant 0 : i32
    %c0_i32_1 = arith.constant 0 : i32
    return %c0_i32, %c0_i32_0 : i32, i32
  }
  func.func @transform_4(%arg0: i32) -> (i32, i32) {
    %c0_i32 = arith.constant 0 : i32
    %c0_i32_0 = arith.constant 0 : i32
    %c0_i32_1 = arith.constant 0 : i32
    return %c0_i32, %c0_i32_0 : i32, i32
  }
  func.func @transform_5(%arg0: i32) -> (i32, i32) {
    %c0_i32 = arith.constant 0 : i32
    %c0_i32_0 = arith.constant 0 : i32
    return %arg0, %c0_i32 : i32, i32
  }
}

</mosaic_0001>

<bundles_post_ra>
// kernel: tpu_custom_call.1
= control target key start
LH: loop header
LB: loop body
LE: loop exit
PB: predicated region body
PF: predicated region fallthrough
CT: control target
= control target key end

     0   :  { %v263_v1 = vmov 0.0   ;;  %vm264_vm0 = vmmov 0   ;;  %vm47_vm1 = vcmask 261120   ;;  %s337_s0 = inlined_call_operand.vmem [shape: f32[8,32], index: 0, kind: input, shape index: {}]   ;;  %s338_s1 = inlined_call_operand.vmem [shape: bf16[32,64], index: 1, kind: input, shape index: {}]   ;;  %s339_s2 = inlined_call_operand.vmem [shape: f32[1,64], index: 2, kind: input, shape index: {}]   ;;  %s340_s3 = inlined_call_operand.vmem [shape: bf16[64,32], index: 3, kind: input, shape index: {}]   ;;  %s341_s4 = inlined_call_operand.vmem [shape: f32[1,32], index: 4, kind: input, shape index: {}]   ;;  %s342_s5 = inlined_call_operand.hbm [shape: f32[8,32], index: 5, kind: output, shape index: {}]  }
   0x1   :  { %v233_v0 = vld [vmem:[%s338_s1] sm:$0xff]   ;;  %210 = vmatprep.subr.bf16.mxu0 %v263_v1  ;;  %v234_v2 = vld [vmem:[%s338_s1 + $0x8] sm:$0xff]   ;;  %218 = vmatprep.subr.bf16.mxu1 %v263_v1 }
   0x2   :  { %211 = vmatpush3.bf16.msra.mxu0 %v233_v0  ;;  %214 = vmatprep.mubr.msk.bf16.mxu0 %vm264_vm0, %v263_v1  ;;  %v22_v3 = vld [vmem:[%s337_s0] sm:$0xff]  ;;  %v236_v5 = vld [vmem:[%s340_s3 + $0x8] sm:$0xff]  }
   0x3   :  { %212 = vmatprep.subr.bf16.mxu0 %v263_v1  ;;  %v235_v4 = vld [vmem:[%s340_s3] sm:$0xff]   ;;  %226 = vmatprep.mubr.msk.bf16.mxu1 %vm264_vm0, %v263_v1  ;;  %v23_v6 = vpack.c.bf16 %v22_v3, %v22_v3 }
   0x4   :  { %219 = vmatpush3.bf16.msra.mxu1 %v235_v4 }
   0x5   :  { %220 = vmatprep.subr.bf16.mxu1 %v263_v1 }
   0x6   :  { %213 = vmatpush3.bf16.msra.mxu0 %v234_v2 }
   0x7   :  { %10 = vsyncpa [#allocation3], 0  ;;  %v237_v7 = vld [vmem:[%s340_s3 + $0x10] sm:$0xff]   ;;  %v238_v8 = vld [vmem:[%s340_s3 + $0x18] sm:$0xff]   ;;  %vm132_vm2 = vcmask 523264   ;;  %s265_s3 = smov [#allocation2]  }
   0x8   :  { %221 = vmatpush3.bf16.msra.mxu1 %v236_v5  ;;  %v192_v9 = vld [vmem:[%s339_s2] ss:$0 sm:$0xff]  ;;  %s184_s9 = sshll.u32 %s265_s3, 4  ;;  %s185_s9 = int_to_ptr.vmem [resolvable:$true] %s184_s9 }
   0x9   :  { %215 = vmatmul.mubr.msk.bf16.vlgmr.msra.gmra.mrb[0].mxu0 %vm47_vm1, %v23_v6  ;;  %222 = vmatprep.subr.bf16.mxu1 %v263_v1  ;;  %v196_v17 = vld [vmem:[%s341_s4] ss:$0 sm:$0xff]  ;;  %s239_s2 = scalar_lea.vmem %s185_s9, 128  ;;  %p244_p1 = scmp.lt.s32.totalorder %s185_s9, %s185_s9 }
   0xa   :  { %p240_p0 = scmp.ne.s32.totalorder %s185_s9, %s239_s2  ;;  %p245_p2 = scmp.lt.s32.totalorder %s239_s2, %s239_s2 }
   0xc   :  { %223 = vmatpush3.bf16.msra.mxu1 %v237_v7  ;;  %p246_p3 = por %p245_p2, %p244_p1 }
   0xd   :  { %224 = vmatprep.subr.bf16.mxu1 %v263_v1 }
   0xe   :  { %p247_p4 = pnand %p246_p3, %p240_p0 }
  0x10   :  { %225 = vmatpush3.bf16.msra.mxu1 %v238_v8 }
  0xdc   :  { %v85_v10 = vpop.f32.mrb[0].mxu0 }
  0xdd   :  { %v86_v11 = vadd.f32 %v192_v9, %v85_v10  ;;  %v216_v12 = vpop.f32.mrb[1].mxu0 }
  0xde   :  { %v88_v13 = vpop.f32.mrb[2].mxu0 }
  0xdf   :  { %v91_v14 = vmax.f32 %v86_v11, 0.0  ;;  %v217_v15 = vpop.f32.mrb[3].mxu0 }
  0xe1   :  { %v92_v16 = vpack.c.bf16 %v91_v14, %v91_v14 }
  0xe3   :  { %227 = vmatmul.mubr.msk.bf16.vlgmr.msra.gmra.mrb[0].mxu1 %vm132_vm2, %v92_v16 }
 0x1b6   :  { %v170_v18 = vpop.f32.mrb[0].mxu1 }
 0x1b7   :  { %v171_v19 = vadd.f32 %v196_v17, %v170_v18  ;;  %v228_v20 = vpop.f32.mrb[1].mxu1 }
 0x1b8   :  { %v173_v21 = vpop.f32.mrb[2].mxu1 }
 0x1b9   :  { %v176_v22 = vmax.f32 %v171_v19, 0.0  ;;  %v229_v23 = vpop.f32.mrb[3].mxu1 }
 0x1bb   :  { %177 = vst.msk [vmem:[#allocation2] sm:$0xff] %vm47_vm1, %v176_v22 }
 0x1bc   :  { %250 = shalt.err (!%p247_p4)
}
 0x1bd   :  { %s251_s11 = scalar_lea.hbm %s342_s5, 128 }
 0x1be   :  { %p252_p5 = scmp.ne.s32.totalorder %s342_s5, %s251_s11  ;;  %p255_p6 = scmp.lt.u32.totalorder %s251_s11, %s342_s5 }
 0x1c0   :  { %p257_p7 = pnand %p255_p6, %p252_p5 }
 0x1c2   :  { %260 = shalt.err (!%p257_p7)
}
 0x1c3   :  { %187 = dma.vmem_to_hbm [thread:$0]  %s185_s9, 128, %s342_s5, [#allocation3]  }
 0x1c4   :  { %261 = dma.done.wait [#allocation3], 128  }
 0x1c5   :  { %262 = vsyncadd [#allocation3], 4294967168 }
 0x1c6   :  { %191 = vsyncpa [#allocation3], 1 }

// kernel: tpu_custom_call.1
= control target key start
LH: loop header
LB: loop body
LE: loop exit
PB: predicated region body
PF: predicated region fallthrough
CT: control target
= control target key end

     0   :  { %v263_v1 = vmov 0.0   ;;  %vm264_vm0 = vmmov 0   ;;  %vm47_vm1 = vcmask 261120   ;;  %s337_s0 = inlined_call_operand.vmem [shape: f32[8,32], index: 0, kind: input, shape index: {}]   ;;  %s338_s1 = inlined_call_operand.vmem [shape: bf16[32,64], index: 1, kind: input, shape index: {}]   ;;  %s339_s2 = inlined_call_operand.vmem [shape: f32[1,64], index: 2, kind: input, shape index: {}]   ;;  %s340_s3 = inlined_call_operand.vmem [shape: bf16[64,32], index: 3, kind: input, shape index: {}]   ;;  %s341_s4 = inlined_call_operand.vmem [shape: f32[1,32], index: 4, kind: input, shape index: {}]   ;;  %s342_s5 = inlined_call_operand.hbm [shape: f32[8,32], index: 5, kind: output, shape index: {}]  }
   0x1   :  { %v233_v0 = vld [vmem:[%s338_s1] sm:$0xff]   ;;  %210 = vmatprep.subr.bf16.mxu0 %v263_v1  ;;  %v234_v2 = vld [vmem:[%s338_s1 + $0x8] sm:$0xff]   ;;  %218 = vmatprep.subr.bf16.mxu1 %v263_v1 }
   0x2   :  { %211 = vmatpush3.bf16.msra.mxu0 %v233_v0  ;;  %214 = vmatprep.mubr.msk.bf16.mxu0 %vm264_vm0, %v263_v1  ;;  %v22_v3 = vld [vmem:[%s337_s0] sm:$0xff]  ;;  %v236_v5 = vld [vmem:[%s340_s3 + $0x8] sm:$0xff]  }
   0x3   :  { %212 = vmatprep.subr.bf16.mxu0 %v263_v1  ;;  %v235_v4 = vld [vmem:[%s340_s3] sm:$0xff]   ;;  %226 = vmatprep.mubr.msk.bf16.mxu1 %vm264_vm0, %v263_v1  ;;  %v23_v6 = vpack.c.bf16 %v22_v3, %v22_v3 }
   0x4   :  { %219 = vmatpush3.bf16.msra.mxu1 %v235_v4 }
   0x5   :  { %220 = vmatprep.subr.bf16.mxu1 %v263_v1 }
   0x6   :  { %213 = vmatpush3.bf16.msra.mxu0 %v234_v2 }
   0x7   :  { %10 = vsyncpa [#allocation3], 0  ;;  %v237_v7 = vld [vmem:[%s340_s3 + $0x10] sm:$0xff]   ;;  %v238_v8 = vld [vmem:[%s340_s3 + $0x18] sm:$0xff]   ;;  %vm132_vm2 = vcmask 523264   ;;  %s265_s3 = smov [#allocation2]  }
   0x8   :  { %221 = vmatpush3.bf16.msra.mxu1 %v236_v5  ;;  %v192_v9 = vld [vmem:[%s339_s2] ss:$0 sm:$0xff]  ;;  %s184_s9 = sshll.u32 %s265_s3, 4  ;;  %s185_s9 = int_to_ptr.vmem [resolvable:$true] %s184_s9 }
   0x9   :  { %215 = vmatmul.mubr.msk.bf16.vlgmr.msra.gmra.mrb[0].mxu0 %vm47_vm1, %v23_v6  ;;  %222 = vmatprep.subr.bf16.mxu1 %v263_v1  ;;  %v196_v17 = vld [vmem:[%s341_s4] ss:$0 sm:$0xff]  ;;  %s239_s2 = scalar_lea.vmem %s185_s9, 128  ;;  %p244_p1 = scmp.lt.s32.totalorder %s185_s9, %s185_s9 }
   0xa   :  { %p240_p0 = scmp.ne.s32.totalorder %s185_s9, %s239_s2  ;;  %p245_p2 = scmp.lt.s32.totalorder %s239_s2, %s239_s2 }
   0xc   :  { %223 = vmatpush3.bf16.msra.mxu1 %v237_v7  ;;  %p246_p3 = por %p245_p2, %p244_p1 }
   0xd   :  { %224 = vmatprep.subr.bf16.mxu1 %v263_v1 }
   0xe   :  { %p247_p4 = pnand %p246_p3, %p240_p0 }
  0x10   :  { %225 = vmatpush3.bf16.msra.mxu1 %v238_v8 }
  0xdc   :  { %v85_v10 = vpop.f32.mrb[0].mxu0 }
  0xdd   :  { %v86_v11 = vadd.f32 %v192_v9, %v85_v10  ;;  %v216_v12 = vpop.f32.mrb[1].mxu0 }
  0xde   :  { %v88_v13 = vpop.f32.mrb[2].mxu0 }
  0xdf   :  { %v91_v14 = vmax.f32 %v86_v11, 0.0  ;;  %v217_v15 = vpop.f32.mrb[3].mxu0 }
  0xe1   :  { %v92_v16 = vpack.c.bf16 %v91_v14, %v91_v14 }
  0xe3   :  { %227 = vmatmul.mubr.msk.bf16.vlgmr.msra.gmra.mrb[0].mxu1 %vm132_vm2, %v92_v16 }
 0x1b6   :  { %v170_v18 = vpop.f32.mrb[0].mxu1 }
 0x1b7   :  { %v171_v19 = vadd.f32 %v196_v17, %v170_v18  ;;  %v228_v20 = vpop.f32.mrb[1].mxu1 }
 0x1b8   :  { %v173_v21 = vpop.f32.mrb[2].mxu1 }
 0x1b9   :  { %v176_v22 = vmax.f32 %v171_v19, 0.0  ;;  %v229_v23 = vpop.f32.mrb[3].mxu1 }
 0x1bb   :  { %177 = vst.msk [vmem:[#allocation2] sm:$0xff] %vm47_vm1, %v176_v22 }
 0x1bc   :  { %250 = shalt.err (!%p247_p4)
}
 0x1bd   :  { %s251_s11 = scalar_lea.hbm %s342_s5, 128 }
 0x1be   :  { %p252_p5 = scmp.ne.s32.totalorder %s342_s5, %s251_s11  ;;  %p255_p6 = scmp.lt.u32.totalorder %s251_s11, %s342_s5 }
 0x1c0   :  { %p257_p7 = pnand %p255_p6, %p252_p5 }
 0x1c2   :  { %260 = shalt.err (!%p257_p7)
}
 0x1c3   :  { %187 = dma.vmem_to_hbm [thread:$0]  %s185_s9, 128, %s342_s5, [#allocation3]  }
 0x1c4   :  { %261 = dma.done.wait [#allocation3], 128  }
 0x1c5   :  { %262 = vsyncadd [#allocation3], 4294967168 }
 0x1c6   :  { %191 = vsyncpa [#allocation3], 1 }

</bundles_post_ra>
